<compile_context>
chip_gen: v7x
topology: tpu7x:2x2x1
jax: 0.10.0
libtpu: 0.0.40
codegen_flags: <defaults>
</compile_context>

<pallas_src>
from functools import partial

import jax
import jax.numpy as jnp
from jax import lax
from jax.experimental import pallas as pl
from jax.experimental.pallas import tpu as pltpu


_NEG_INF = float(-1e30)  # finite "minus infinity" (avoids inf-inf NaNs; representable in bf16)


def _round_up(x, m):
    return ((x + m - 1) // m) * m


# ---------------------------------------------------------------------------
# Pass 1: K / V 1x1-conv projection (head-major), done ONCE per key element.
# ---------------------------------------------------------------------------
def _kv_project_kernel(k_ref, v_ref, w_ref, b_ref, ko_ref, vo_ref,
                       *, n_heads, dim, compute_dtype):
    """One grid step = (batch b, key tile ki).

    k_ref / v_ref : (1, d_model, tk) raw inputs.
    w_ref         : (2, d_model, d_model) [Wk, Wv] (head-major permuted rows).
    b_ref         : (2, d_model, 1)       [bk, bv] (f32).
    ko_ref        : (1, H, dim,   tk) projected K (compute_dtype).
    vo_ref        : (1, H, dim+1, tk) projected V with a ones row appended
                    (the ones row turns sum(p) into an MXU output column).
    """
    f32 = jnp.float32
    xk = k_ref[0].astype(compute_dtype)
    xv = v_ref[0].astype(compute_dtype)
    tk = xk.shape[-1]
    k = jnp.dot(w_ref[0], xk, preferred_element_type=f32) + b_ref[0]   # (d_model, tk)
    v = jnp.dot(w_ref[1], xv, preferred_element_type=f32) + b_ref[1]   # (d_model, tk)
    ko_ref[0] = k.reshape(n_heads, dim, tk).astype(ko_ref.dtype)
    v3 = v.reshape(n_heads, dim, tk)
    ones = jnp.ones((n_heads, 1, tk), f32)
    vo_ref[0] = jnp.concatenate([v3, ones], axis=1).astype(vo_ref.dtype)


# ---------------------------------------------------------------------------
# Pass 2: flash attention over precomputed head-major K / V.
# ---------------------------------------------------------------------------
def _flash_attn_kernel(*refs, n_heads, dim, has_mask, compute_dtype, exp_dtype):
    """One grid step = (batch b, query tile qi, key tile ki).

    Refs (in order): q (1,d_model,tq), k (1,H,dim,tk), v (1,H,dim+1,tk),
    W=[Wq*scale,Wm] (2,d_model,d_model), B=[bq*scale,bm] (2,d_model,1),
    [kmask (1,tk) additive bias, only if has_mask], out (1,d_model,tq),
    then scratches q_scr (H,tq,dim), m_scr (H,tq,1), l_scr (H,tq,1),
    acc_scr (H,tq,dim).
    """
    if has_mask:
        (q_ref, k_ref, v_ref, w_ref, b_ref, mask_ref, o_ref,
         q_scr, m_scr, l_scr, acc_scr) = refs
    else:
        (q_ref, k_ref, v_ref, w_ref, b_ref, o_ref,
         q_scr, m_scr, l_scr, acc_scr) = refs
        mask_ref = None

    ki = pl.program_id(2)
    nk = pl.num_programs(2)
    f32 = jnp.float32
    d_model = n_heads * dim

    @pl.when(ki == 0)
    def _init():
        # Q projection once per query tile (amortized over all key tiles).
        xq = q_ref[0].astype(compute_dtype)                                  # (d_model, tq)
        q = jnp.dot(w_ref[0], xq, preferred_element_type=f32) + b_ref[0]     # (d_model, tq)
        q3 = q.reshape(n_heads, dim, q.shape[-1])                            # head-major split
        q_scr[...] = jnp.transpose(q3, (0, 2, 1)).astype(compute_dtype)      # (H, tq, dim)
        m_scr[...] = jnp.full(m_scr.shape, _NEG_INF, f32)
        l_scr[...] = jnp.zeros(l_scr.shape, f32)
        acc_scr[...] = jnp.zeros(acc_scr.shape, f32)

    k = k_ref[0]                       # (H, dim,   tk) compute_dtype, already projected
    v = v_ref[0]                       # (H, dim+1, tk) compute_dtype, last row = 1

    # scores (H, tq, tk) = q_scr (H,tq,dim) . k (H,dim,tk)  [canonical NN batched matmul]
    s = lax.dot_general(q_scr[...], k, (((2,), (1,)), ((0,), (0,))),
                        preferred_element_type=f32)
    if mask_ref is not None:
        # Additive key-pad bias (0 for valid, -1e30 for padded lanes): one VPU
        # add per step instead of iota+compare+select on every key tile.
        s = s + mask_ref[...]

    # Online softmax (stats in f32; exp optionally in bf16 on EUP-bf16 chips).
    m_prev = m_scr[...]
    m_new = jnp.maximum(m_prev, jnp.max(s, axis=-1, keepdims=True))          # (H, tq, 1)
    alpha = jnp.exp(m_prev - m_new)                                          # f32, tiny
    p = jnp.exp((s - m_new).astype(exp_dtype)).astype(compute_dtype)         # (H, tq, tk)

    # P.[V;1]: (H,tq,tk) x (H,dim+1,tk) contracted on last dims [NT batched matmul].
    # Column `dim` of the result is sum(p) -> softmax denominator via the MXU.
    pv_ext = lax.dot_general(p, v, (((2,), (2,)), ((0,), (0,))),
                             preferred_element_type=f32)                     # (H, tq, dim+1)
    l_scr[...] = alpha * l_scr[...] + pv_ext[:, :, dim:]
    acc_scr[...] = alpha * acc_scr[...] + pv_ext[:, :, :dim]
    m_scr[...] = m_new

    @pl.when(ki == nk - 1)
    def _finalize():
        inv_l = pl.reciprocal(l_scr[...], approx=(compute_dtype != jnp.float32))
        o = acc_scr[...] * inv_l                                             # (H, tq, dim) f32
        o_flat = jnp.transpose(o, (0, 2, 1)).reshape(d_model, o.shape[1])    # (d_model, tq)
        out = jnp.dot(w_ref[1], o_flat.astype(compute_dtype),
                      preferred_element_type=f32) + b_ref[1]
        o_ref[0] = out.astype(o_ref.dtype)


# ---------------------------------------------------------------------------
# Wrapper helpers.
# ---------------------------------------------------------------------------
def _prepare_params(params, n_heads, compute_dtype):
    """Permute channels to head-major (c' = h*dim + d), fold 1/sqrt(dim) into Wq/bq,
    and split into the flash-pass stack [Wq,Wm] and the projection-pass stack [Wk,Wv]."""
    Wq, bq, Wk, bk, Wv, bv, Wm, bm = params
    d_model = Wq.shape[0]
    dim = d_model // n_heads
    # perm[h*dim + d] = d*n_heads + h  (original PyTorch .view(b, dim, n_heads, -1) layout)
    perm = jnp.arange(d_model).reshape(dim, n_heads).T.reshape(-1)
    scale = 1.0 / (float(dim) ** 0.5)

    Wq_p, bq_p = Wq[perm, :] * scale, bq[perm] * scale
    Wk_p, bk_p = Wk[perm, :], bk[perm]
    Wv_p, bv_p = Wv[perm, :], bv[perm]
    Wm_p = Wm[:, perm]                          # output channels unchanged

    W_qm = jnp.stack([Wq_p, Wm_p]).astype(compute_dtype)                 # (2, d_model, d_model)
    B_qm = jnp.stack([bq_p, bm]).reshape(2, d_model, 1).astype(jnp.float32)
    W_kv = jnp.stack([Wk_p, Wv_p]).astype(compute_dtype)                 # (2, d_model, d_model)
    B_kv = jnp.stack([bk_p, bv_p]).reshape(2, d_model, 1).astype(jnp.float32)
    return W_qm, B_qm, W_kv, B_kv


def _vmem_budget_bytes():
    """Physical VMEM per core minus headroom (v5e/v6e: 128 MiB, v7x: 64 MiB)."""
    try:
        cap = int(pltpu.get_tpu_info().vmem_capacity_bytes)
    except Exception:
        cap = 64 << 20   # conservative default (v7x-sized)
    return max(32 << 20, cap - (8 << 20))


def _flash_vmem_need(d_model, n_heads, dim, tq, tk, cb, ib):
    """Rough flash-pass VMEM footprint (double-buffered tiles, lane-padded scratches)."""
    weights = 2 * (2 * d_model * d_model * cb + 2 * d_model * 4)   # [Wq,Wm]/[bq,bm], 2 bufs
    q_io = 2 * 2 * d_model * tq * ib                               # q in + out, 2 bufs each
    kv = 2 * n_heads * (2 * dim + 1) * tk * cb                     # K + V(+ones) tiles, 2 bufs
    scratch = n_heads * tq * (dim * (cb + 4) + 2 * 128 * 4)        # q_scr/acc + lane-padded m/l
    live = (n_heads * tq * tk * (4 + cb)                           # s (f32) + p
            + n_heads * tq * 128 * 4                               # pv_ext (lane-padded)
            + 3 * d_model * tq * 4)                                # q-projection temporaries
    return weights + q_io + kv + scratch + live + (2 << 20)


def _eup_bf16_ok():
    """bf16-capable EUP (exp) -- true on v6e/v7x, false on v5e and older."""
    try:
        kind = jax.devices()[0].device_kind.lower()
    except Exception:
        return False
    return not any(f"v{i}" in kind for i in (2, 3, 4, 5))


# ---------------------------------------------------------------------------
# Public forward.
# ---------------------------------------------------------------------------
def attention_forward(query, key, value, params, n_heads, *,
                      tq=256, tk=256, compute_dtype=jnp.bfloat16):
    """query: (B, d_model, N); key/value: (B, d_model, M). Returns (B, d_model, N).

    compute_dtype feeds the MXU (bf16 default); accumulation and softmax stats
    are always f32.
    """
    b, d_model, n = query.shape
    m = key.shape[2]
    assert d_model % n_heads == 0
    dim = d_model // n_heads
    io_dtype = query.dtype

    W_qm, B_qm, W_kv, B_kv = _prepare_params(params, n_heads, compute_dtype)

    # Lane-dense 128-aligned tiles; never over-tile tiny sequences.
    tq = min(_round_up(tq, 128), _round_up(n, 128))
    tk = min(_round_up(tk, 128), _round_up(m, 128))

    # Re-derive tiling against the *physical* VMEM budget (64 MiB on v7x).
    cb = jnp.dtype(compute_dtype).itemsize
    ib = jnp.dtype(io_dtype).itemsize
    budget = _vmem_budget_bytes()
    while _flash_vmem_need(d_model, n_heads, dim, tq, tk, cb, ib) > budget and tk > 128:
        tk -= 128
    while _flash_vmem_need(d_model, n_heads, dim, tq, tk, cb, ib) > budget and tq > 128:
        tq -= 128
    need = _flash_vmem_need(d_model, n_heads, dim, tq, tk, cb, ib)
    vmem_limit = None if need <= (32 << 20) else int(min(need, budget))

    nq, nk = pl.cdiv(n, tq), pl.cdiv(m, tk)
    n_pad, m_pad = nq * tq, nk * tk
    qp = jnp.pad(query, ((0, 0), (0, 0), (0, n_pad - n))) if n_pad != n else query
    kp = jnp.pad(key, ((0, 0), (0, 0), (0, m_pad - m))) if m_pad != m else key
    vp = jnp.pad(value, ((0, 0), (0, 0), (0, m_pad - m))) if m_pad != m else value

    # ---------------- Pass 1: project K/V once (head-major, ones row on V). ----------------
    proj_cost = pl.CostEstimate(
        flops=int(4 * b * d_model * d_model * m_pad),
        transcendentals=0,
        bytes_accessed=int(b * m_pad * (2 * d_model * ib + n_heads * (2 * dim + 1) * cb)
                           + 2 * d_model * d_model * cb),
    )
    k_proj, v_proj = pl.pallas_call(
        partial(_kv_project_kernel, n_heads=n_heads, dim=dim, compute_dtype=compute_dtype),
        out_shape=(jax.ShapeDtypeStruct((b, n_heads, dim, m_pad), compute_dtype),
                   jax.ShapeDtypeStruct((b, n_heads, dim + 1, m_pad), compute_dtype)),
        grid=(b, nk),
        in_specs=[
            pl.BlockSpec((1, d_model, tk), lambda bi, ki: (bi, 0, ki)),        # key tile
            pl.BlockSpec((1, d_model, tk), lambda bi, ki: (bi, 0, ki)),        # value tile
            pl.BlockSpec((2, d_model, d_model), lambda bi, ki: (0, 0, 0)),     # [Wk, Wv]
            pl.BlockSpec((2, d_model, 1), lambda bi, ki: (0, 0, 0)),           # [bk, bv]
        ],
        out_specs=(
            pl.BlockSpec((1, n_heads, dim, tk), lambda bi, ki: (bi, 0, 0, ki)),
            pl.BlockSpec((1, n_heads, dim + 1, tk), lambda bi, ki: (bi, 0, 0, ki)),
        ),
        compiler_params=pltpu.CompilerParams(
            dimension_semantics=("parallel", "parallel")),
        cost_estimate=proj_cost,
    )(kp, vp, W_kv, B_kv)

    # ---------------- Pass 2: flash attention over precomputed K/V. ----------------
    has_mask = (m_pad != m)
    exp_dtype = compute_dtype if (compute_dtype != jnp.float32 and _eup_bf16_ok()) \
        else jnp.float32
    kernel = partial(_flash_attn_kernel, n_heads=n_heads, dim=dim, has_mask=has_mask,
                     compute_dtype=compute_dtype, exp_dtype=exp_dtype)

    in_specs = [
        pl.BlockSpec((1, d_model, tq), lambda bi, qi, ki: (bi, 0, qi)),            # query tile
        pl.BlockSpec((1, n_heads, dim, tk), lambda bi, qi, ki: (bi, 0, 0, ki)),    # projected K
        pl.BlockSpec((1, n_heads, dim + 1, tk), lambda bi, qi, ki: (bi, 0, 0, ki)),  # projected V
        pl.BlockSpec((2, d_model, d_model), lambda bi, qi, ki: (0, 0, 0)),         # [Wq*s, Wm]
        pl.BlockSpec((2, d_model, 1), lambda bi, qi, ki: (0, 0, 0)),               # [bq*s, bm]
    ]
    args = [qp, k_proj, v_proj, W_qm, B_qm]
    if has_mask:
        kmask = jnp.where(jnp.arange(m_pad) < m, 0.0, _NEG_INF)
        kmask = kmask.astype(jnp.float32).reshape(1, m_pad)
        in_specs.append(pl.BlockSpec((1, tk), lambda bi, qi, ki: (0, ki)))
        args.append(kmask)

    flash_cost = pl.CostEstimate(
        flops=int(b * (4 * d_model * d_model * n_pad + 4 * d_model * n_pad * m_pad)),
        transcendentals=int(b * n_heads * n_pad * m_pad),
        bytes_accessed=int(b * (2 * d_model * n_pad * ib
                                + nq * n_heads * (2 * dim + 1) * m_pad * cb)
                           + 2 * d_model * d_model * cb),
    )

    out = pl.pallas_call(
        kernel,
        out_shape=jax.ShapeDtypeStruct((b, d_model, n_pad), io_dtype),
        grid=(b, nq, nk),
        in_specs=in_specs,
        out_specs=pl.BlockSpec((1, d_model, tq), lambda bi, qi, ki: (bi, 0, qi)),
        scratch_shapes=[
            pltpu.VMEM((n_heads, tq, dim), compute_dtype),   # projected query
            pltpu.VMEM((n_heads, tq, 1), jnp.float32),       # running max
            pltpu.VMEM((n_heads, tq, 1), jnp.float32),       # running denominator
            pltpu.VMEM((n_heads, tq, dim), jnp.float32),     # output accumulator
        ],
        compiler_params=pltpu.CompilerParams(
            dimension_semantics=("parallel", "parallel", "arbitrary"),
            vmem_limit_bytes=vmem_limit,
        ),
        cost_estimate=flash_cost,
    )(*args)

    return out[:, :, :n] if n_pad != n else out


# ---------------------------------------------------------------------------
# Pure-JAX reference + init (mirror the PyTorch module exactly).
# ---------------------------------------------------------------------------
def attention_ref(query, key, value, params, n_heads):
    Wq, bq, Wk, bk, Wv, bv, Wm, bm = params
    b, d_model, _ = query.shape
    dim = d_model // n_heads

    def conv1x1(W, bias, x):
        return jnp.einsum('oi,bil->bol', W, x) + bias[None, :, None]

    q = conv1x1(Wq, bq, query).reshape(b, dim, n_heads, -1)
    k = conv1x1(Wk, bk, key).reshape(b, dim, n_heads, -1)
    v = conv1x1(Wv, bv, value).reshape(b, dim, n_heads, -1)
    scores = jnp.einsum('bdhn,bdhm->bhnm', q, k) / (float(dim) ** 0.5)
    attn = jax.nn.softmax(scores, axis=-1)
    o = jnp.einsum('bhnm,bdhm->bdhn', attn, v).reshape(b, d_model, -1)
    return conv1x1(Wm, bm, o)


def init_params(key, d_model):
    """Deterministic init mimicking nn.Conv1d default (uniform +/-1/sqrt(fan_in))."""
    bound = 1.0 / (d_model ** 0.5)
    keys = jax.random.split(key, 8)

    def u(k, shape):
        return jax.random.uniform(k, shape, jnp.float32, -bound, bound)

    Wq, Wk, Wv, Wm = (u(keys[i], (d_model, d_model)) for i in range(4))
    bq, bk, bv, bm = (u(keys[4 + i], (d_model,)) for i in range(4))
    return (Wq, bq, Wk, bk, Wv, bv, Wm, bm)


if __name__ == "__main__":
    n_heads = 4
    d_model = 32
    b = 2

    root = jax.random.PRNGKey(0)
    kp_, kq_, kk_, kv_ = jax.random.split(root, 4)
    params = init_params(kp_, d_model)

    # Case 1: tiny sequences (single padded 128-wide tile), explicit f32 path -> tight tolerance.
    n, m = 16, 16
    query = jax.random.normal(kq_, (b, d_model, n), jnp.float32)
    key = jax.random.normal(kk_, (b, d_model, m), jnp.float32)
    value = jax.random.normal(kv_, (b, d_model, m), jnp.float32)
    ref = attention_ref(query, key, value, params, n_heads)

    out_f32 = jax.block_until_ready(
        attention_forward(query, key, value, params, n_heads, compute_dtype=jnp.float32))
    assert out_f32.shape == (b, d_model, n)
    assert jnp.allclose(out_f32, ref, atol=5e-4, rtol=5e-4), "f32 path mismatch vs reference"

    # Case 2: multiple query + key tiles with padding (nq=2, nk=2) -> exercises the online
    # softmax, the additive key-pad mask, and the padded-query slicing; still f32 / tight.
    n2, m2 = 200, 200
    q2 = jax.random.normal(jax.random.fold_in(kq_, 1), (b, d_model, n2), jnp.float32)
    k2 = jax.random.normal(jax.random.fold_in(kk_, 1), (b, d_model, m2), jnp.float32)
    v2 = jax.random.normal(jax.random.fold_in(kv_, 1), (b, d_model, m2), jnp.float32)
    ref2 = attention_ref(q2, k2, v2, params, n_heads)
    out2_f32 = jax.block_until_ready(
        attention_forward(q2, k2, v2, params, n_heads, tq=128, tk=128,
                          compute_dtype=jnp.float32))
    assert out2_f32.shape == (b, d_model, n2)
    assert jnp.allclose(out2_f32, ref2, atol=5e-4, rtol=5e-4), "multi-tile f32 mismatch"

    # Case 3: default bf16 MXU-feeding path (f32 accumulation / softmax stats) -> loose tolerance.
    out_bf16 = jax.block_until_ready(attention_forward(query, key, value, params, n_heads))
    assert out_bf16.shape == (b, d_model, n)
    assert jnp.allclose(out_bf16, ref, atol=8e-2, rtol=8e-2), "bf16 path mismatch"

    out2_bf16 = jax.block_until_ready(
        attention_forward(q2, k2, v2, params, n_heads, tq=128, tk=128))
    assert jnp.allclose(out2_bf16, ref2, atol=8e-2, rtol=8e-2), "multi-tile bf16 mismatch"

    print("KERNEL_OK")
</pallas_src>

<mosaic_0001>
module attributes {stable_mosaic.version = 11 : i64} {
  func.func @_kv_project_kernel(%arg0: i32, %arg1: i32, %arg2: memref<1x32x128xf32, #tpu.memory_space<vmem>>, %arg3: memref<1x32x128xf32, #tpu.memory_space<vmem>>, %arg4: memref<2x32x32xf32, #tpu.memory_space<vmem>>, %arg5: memref<2x32x1xf32, #tpu.memory_space<vmem>>, %arg6: memref<1x4x8x128xf32, #tpu.memory_space<vmem>>, %arg7: memref<1x4x9x128xf32, #tpu.memory_space<vmem>>) attributes {dimension_semantics = [#tpu.dimension_semantics<parallel>, #tpu.dimension_semantics<parallel>], iteration_bounds = array<i64: 2, 1>, scalar_prefetch = 0 : i64, scratch_operands = 0 : i64, tpu.core_type = #tpu.core_type<tc>, window_params = [{transform_indices = @transform_0, window_bounds = array<i64: 1, 32, 128>}, {transform_indices = @transform_1, window_bounds = array<i64: 1, 32, 128>}, {pipeline_mode = #tpu.pipeline_mode<synchronous>, transform_indices = @transform_2, window_bounds = array<i64: 2, 32, 32>}, {pipeline_mode = #tpu.pipeline_mode<synchronous>, transform_indices = @transform_3, window_bounds = array<i64: 2, 32, 1>}, {transform_indices = @transform_4, window_bounds = array<i64: 1, 4, 8, 128>}, {transform_indices = @transform_5, window_bounds = array<i64: 1, 4, 9, 128>}]} {
    %c0 = arith.constant 0 : index
    %c0_0 = arith.constant 0 : index
    %c0_1 = arith.constant 0 : index
    %0 = vector.load %arg2[%c0, %c0_0, %c0_1] : memref<1x32x128xf32, #tpu.memory_space<vmem>>, vector<1x32x128xf32>
    %1 = vector.shape_cast %0 : vector<1x32x128xf32> to vector<32x128xf32>
    %c0_2 = arith.constant 0 : index
    %c0_3 = arith.constant 0 : index
    %c0_4 = arith.constant 0 : index
    %2 = vector.load %arg3[%c0_2, %c0_3, %c0_4] : memref<1x32x128xf32, #tpu.memory_space<vmem>>, vector<1x32x128xf32>
    %3 = vector.shape_cast %2 : vector<1x32x128xf32> to vector<32x128xf32>
    %c0_5 = arith.constant 0 : index
    %c0_6 = arith.constant 0 : index
    %c0_7 = arith.constant 0 : index
    %4 = vector.load %arg4[%c0_5, %c0_6, %c0_7] : memref<2x32x32xf32, #tpu.memory_space<vmem>>, vector<1x32x32xf32>
    %5 = vector.shape_cast %4 : vector<1x32x32xf32> to vector<32x32xf32>
    %cst = arith.constant dense<0.000000e+00> : vector<32x128xf32>
    %6 = tpu.matmul %5, %1, %cst {dimension_numbers = #tpu.dot_dimension_numbers<[1], [0], [0], [1], [0, 0, 1, 1], [], []>} : vector<32x32xf32>, vector<32x128xf32>, vector<32x128xf32> -> vector<32x128xf32>
    %c0_8 = arith.constant 0 : index
    %c0_9 = arith.constant 0 : index
    %c0_10 = arith.constant 0 : index
    %7 = vector.load %arg5[%c0_8, %c0_9, %c0_10] : memref<2x32x1xf32, #tpu.memory_space<vmem>>, vector<1x32x1xf32>
    %8 = vector.shape_cast %7 : vector<1x32x1xf32> to vector<32x1xf32>
    %9 = vector.broadcast %8 : vector<32x1xf32> to vector<32x128xf32>
    %10 = arith.addf %6, %9 : vector<32x128xf32>
    %c1 = arith.constant 1 : index
    %c0_11 = arith.constant 0 : index
    %c0_12 = arith.constant 0 : index
    %11 = vector.load %arg4[%c1, %c0_11, %c0_12] : memref<2x32x32xf32, #tpu.memory_space<vmem>>, vector<1x32x32xf32>
    %12 = vector.shape_cast %11 : vector<1x32x32xf32> to vector<32x32xf32>
    %cst_13 = arith.constant dense<0.000000e+00> : vector<32x128xf32>
    %13 = tpu.matmul %12, %3, %cst_13 {dimension_numbers = #tpu.dot_dimension_numbers<[1], [0], [0], [1], [0, 0, 1, 1], [], []>} : vector<32x32xf32>, vector<32x128xf32>, vector<32x128xf32> -> vector<32x128xf32>
    %c1_14 = arith.constant 1 : index
    %c0_15 = arith.constant 0 : index
    %c0_16 = arith.constant 0 : index
    %14 = vector.load %arg5[%c1_14, %c0_15, %c0_16] : memref<2x32x1xf32, #tpu.memory_space<vmem>>, vector<1x32x1xf32>
    %15 = vector.shape_cast %14 : vector<1x32x1xf32> to vector<32x1xf32>
    %16 = vector.broadcast %15 : vector<32x1xf32> to vector<32x128xf32>
    %17 = arith.addf %13, %16 : vector<32x128xf32>
    %18 = vector.shape_cast %10 : vector<32x128xf32> to vector<4x8x128xf32>
    %c0_17 = arith.constant 0 : index
    %c0_18 = arith.constant 0 : index
    %c0_19 = arith.constant 0 : index
    %c0_20 = arith.constant 0 : index
    %19 = vector.load %arg6[%c0_17, %c0_18, %c0_19, %c0_20] : memref<1x4x8x128xf32, #tpu.memory_space<vmem>>, vector<1x4x8x128xf32>
    %20 = vector.shape_cast %19 : vector<1x4x8x128xf32> to vector<4x8x128xf32>
    %21 = vector.shape_cast %18 : vector<4x8x128xf32> to vector<1x4x8x128xf32>
    tpu.vector_store %arg6[%c0_17, %c0_18, %c0_19, %c0_20], %21 {strides = array<i32>} : memref<1x4x8x128xf32, #tpu.memory_space<vmem>>, vector<1x4x8x128xf32>,
    %22 = vector.shape_cast %17 : vector<32x128xf32> to vector<4x8x128xf32>
    %cst_21 = arith.constant 1.000000e+00 : f32
    %23 = vector.broadcast %cst_21 : f32 to vector<4x1x128xf32>
    %24 = tpu.concatenate %22, %23 in 1 : vector<4x8x128xf32>, vector<4x1x128xf32> -> vector<4x9x128xf32>
    %c0_22 = arith.constant 0 : index
    %c0_23 = arith.constant 0 : index
    %c0_24 = arith.constant 0 : index
    %c0_25 = arith.constant 0 : index
    %25 = vector.load %arg7[%c0_22, %c0_23, %c0_24, %c0_25] : memref<1x4x9x128xf32, #tpu.memory_space<vmem>>, vector<1x4x9x128xf32>
    %26 = vector.shape_cast %25 : vector<1x4x9x128xf32> to vector<4x9x128xf32>
    %27 = vector.shape_cast %24 : vector<4x9x128xf32> to vector<1x4x9x128xf32>
    tpu.vector_store %arg7[%c0_22, %c0_23, %c0_24, %c0_25], %27 {strides = array<i32>} : memref<1x4x9x128xf32, #tpu.memory_space<vmem>>, vector<1x4x9x128xf32>,
    return
  }
  func.func @transform_0(%arg0: i32, %arg1: i32) -> (i32, i32, i32) {
    %c0_i32 = arith.constant 0 : i32
    %c0_i32_0 = arith.constant 0 : i32
    return %arg0, %c0_i32, %arg1 : i32, i32, i32
  }
  func.func @transform_1(%arg0: i32, %arg1: i32) -> (i32, i32, i32) {
    %c0_i32 = arith.constant 0 : i32
    %c0_i32_0 = arith.constant 0 : i32
    return %arg0, %c0_i32, %arg1 : i32, i32, i32
  }
  func.func @transform_2(%arg0: i32, %arg1: i32) -> (i32, i32, i32) {
    %c0_i32 = arith.constant 0 : i32
    %c0_i32_0 = arith.constant 0 : i32
    %c0_i32_1 = arith.constant 0 : i32
    %c0_i32_2 = arith.constant 0 : i32
    return %c0_i32, %c0_i32_0, %c0_i32_1 : i32, i32, i32
  }
  func.func @transform_3(%arg0: i32, %arg1: i32) -> (i32, i32, i32) {
    %c0_i32 = arith.constant 0 : i32
    %c0_i32_0 = arith.constant 0 : i32
    %c0_i32_1 = arith.constant 0 : i32
    %c0_i32_2 = arith.constant 0 : i32
    return %c0_i32, %c0_i32_0, %c0_i32_1 : i32, i32, i32
  }
  func.func @transform_4(%arg0: i32, %arg1: i32) -> (i32, i32, i32, i32) {
    %c0_i32 = arith.constant 0 : i32
    %c0_i32_0 = arith.constant 0 : i32
    %c0_i32_1 = arith.constant 0 : i32
    return %arg0, %c0_i32, %c0_i32_0, %arg1 : i32, i32, i32, i32
  }
  func.func @transform_5(%arg0: i32, %arg1: i32) -> (i32, i32, i32, i32) {
    %c0_i32 = arith.constant 0 : i32
    %c0_i32_0 = arith.constant 0 : i32
    %c0_i32_1 = arith.constant 0 : i32
    return %arg0, %c0_i32, %c0_i32_0, %arg1 : i32, i32, i32, i32
  }
}

</mosaic_0001>

<bundles_post_ra>
// kernel: tpu_custom_call.1
= control target key start
LH: loop header
LB: loop body
LE: loop exit
PB: predicated region body
PF: predicated region fallthrough
CT: control target
= control target key end

     0   :  { %11 = vsyncpa [#allocation3], 0  ;;  %s1417_s0 = inlined_call_operand.vmem [shape: f32[2,32,128], index: 0, kind: input, shape index: {}]   ;;  %s1418_s1 = inlined_call_operand.hbm [shape: f32[2,32,128], index: 1, kind: input, shape index: {}]   ;;  %s1419_s2 = inlined_call_operand.hbm [shape: f32[2,32,32], index: 2, kind: input, shape index: {}]   ;;  %s1420_s3 = inlined_call_operand.vmem [shape: f32[2,32,1], index: 3, kind: input, shape index: {}]   ;;  %s1421_s4 = inlined_call_operand.hbm [shape: f32[2,4,8,128], index: 4, kind: output, shape index: {0}]   ;;  %s1422_s5 = inlined_call_operand.vmem [shape: f32[2,4,9,128], index: 5, kind: output, shape index: {1}]  }
   0x1   :  { %13 = vsyncpa [#allocation3 + $0x1], 0 }
   0x2   :  { %14 = vsyncpa [#allocation6], 0 }
   0x3   :  { %15 = vsyncpa [#allocation4], 0 }
   0x4   :  { %17 = vsyncpa [#allocation4 + $0x1], 0  ;;  %s1138_s18 = smov 0   ;;  %s1140_s19 = smov 0  }
   0x5   :  { %s1142_s20 = smov 0   ;;  %s1144_s21 = smov 0  }
   0x6   :  { %s1146_s22 = smov 0   ;;  %s1148_s23 = smov 0  }
   0x7 LB: > { %s775_s24 = sadd.s32 4294967295, %s1097_s23   ;;  %s776_s25 = sadd.s32 4294967294, %s1097_s23   ;;  %s1097_s23 = sphi %s1148_s23, %s23_s23   ;;  %s1093_s22 = sphi %s1146_s22, %s1448_s22   ;;  %s1089_s21 = sphi %s1144_s21, %s1447_s21   ;;  %s1085_s20 = sphi %s1142_s20, %s1446_s20   ;;  %s1081_s19 = sphi %s1140_s19, %s1445_s19   ;;  %s1077_s18 = sphi %s1138_s18, %s1444_s18  }
   0x8   : > { %p85_p0 = scmp.ne.s32.totalorder %s1081_s19, %s1077_s18  ;;  %p1172_p1 = scmp.eq.s32.totalorder %s775_s24, 0 }
   0x9   : > { %p1176_p2 = scmp.eq.s32.totalorder %s775_s24, 1  ;;  %p159_p3 = scmp.eq.s32.totalorder %s776_s25, 1 }
   0xa   : > { %s1428_s26 = scalar_select %p1172_p1, 1, 0 }
   0xb   : > { %s1429_s27 = scalar_select %p1176_p2, 1, 0 }
   0xc   : > { %p1182_p4 = por %p1172_p1, %p85_p0  ;;  %p777_p5 = scmp.ge.s32.totalorder %s1097_s23, 1 }
   0xd   : > { %p1187_p6 = por %p159_p3, %p85_p0  ;;  %p194_p7 = scmp.lt.s32.totalorder %s1097_s23, 3 }
   0xe   : > { %s1430_s28 = scalar_select %p1182_p4, 1, 0 }
   0xf   : > { %s1431_s29 = scalar_select %p1187_p6, 1, 0 }
  0x10   : > { %p1192_p8 = pnand %p777_p5, %p194_p7  ;;  %s1099_s6 = smov [#allocation5]  }
  0x11   : > { %s206_s7 = sshll.u32 %s1099_s6, 4  ;;  %s35_s9 = sadd.s32 1, %s1093_s22  ;;  %s207_s7 = int_to_ptr.vmem [resolvable:$true] %s206_s7 }
  0x12   : > { %s1432_s30 = scalar_select %p1192_p8, 1, 0 }
  0x13   : > { %p880_p9 = pneg %p1192_p8  ;;  %s953_s12 = scalar_lea.hbm %s1419_s2, 1024 }
  0x14   : > { %p954_p12 = scmp.ne.s32.totalorder %s1419_s2, %s953_s12  ;;  %p960_p5 = scmp.lt.u32.totalorder %s953_s12, %s1419_s2 }
  0x15   : > { %p1201_p11 = pnand %p880_p9, %p1172_p1 }
  0x17   : > { %p955_p13 = pneg %p1201_p11 }
  0x19   : > { %p956_p0 = pnand %p955_p13, %p954_p12 }
  0x1b   : > { %p957_p3 = pneg %p956_p0 }
  0x1d   : > { %p962_p7 = pnand %p960_p5, %p957_p3 }
  0x1f   : > { %965 = shalt.err (!%p962_p7)
}
  0x20   : > { %s966_s17 = scalar_lea.vmem %s207_s7, 1024  ;;  %p974_p1 = scmp.lt.s32.totalorder %s207_s7, %s207_s7 }
  0x21   : > { %p967_p9 = scmp.ne.s32.totalorder %s207_s7, %s966_s17  ;;  %p975_p4 = scmp.lt.s32.totalorder %s966_s17, %s966_s17 }
  0x23   : > { %p969_p10 = pnand %p967_p9, %p955_p13  ;;  %p976_p8 = por %p975_p4, %p974_p1 }
  0x25   : > { %p970_p6 = pneg %p969_p10 }
  0x27   : > { %p977_p2 = pnand %p976_p8, %p970_p6 }
  0x29   : > { %980 = shalt.err (!%p977_p2)
}
  0x2a   : > { %s1427_s24 = smov 128   ;;  %s1101_s25 = smov 8  }
  0x2b   : > { %883 = dma.hbm_to_vmem [thread:$0]  (!%p1201_p11), %s1419_s2, 1024, %s207_s7, [#allocation6], %s1427_s24, %s1427_s24, %s1101_s25  }
  0x2c   : > { %p37_p1 = scmp.ge.s32.totalorder %s35_s9, 2  ;;  %s72_s11 = sadd.s32 1, %s1085_s20 }
  0x2d   : > { %p79_p2 = scmp.ne.s32.totalorder %s1085_s20, %s1081_s19  ;;  %p80_p4 = scmp.eq.s32.totalorder %s1097_s23, 0 }
  0x2e   : > { %s1450_s9 = smov (%p37_p1, %s35_s9), 0  ;;  %p1435_p8 = scmp.ne.s32.totalorder %s1429_s27, 0 }
  0x2f   : > { %p1231_p6 = por %p80_p4, %p79_p2  ;;  %s67_s13 = ssub.s32 %s1093_s22, %s1450_s9 }
  0x30   : > { %p1237_p10 = por %p1435_p8, %p79_p2  ;;  %p893_p12 = scmp.lt.s32.totalorder %s1097_s23, 2 }
  0x31   : > { %p70_p11 = scmp.eq.s32.totalorder %s67_s13, 0  ;;  %s234_s7 = sand.u32 1, %s1085_s20  }
  0x32   : > { %s780_s14 = sshll.u32 %s234_s7, 5  ;;  %s808_s16 = sshll.u32 %s1093_s22, 9 }
  0x33   : > { %s1246_s15 = scalar_select %p70_p11, %s1085_s20, %s72_s11  }
  0x34   : > { %s1252_s10 = scalar_lea.hbm %s1418_s1, %s808_s16  ;;  %s238_s27 = scalar_lea.vmem [#allocation2], %s780_s14 }
  0x35   : > { %s246_s24 = sshll.u32 %s238_s27, 4  ;;  %p1258_p13 = pnand %p893_p12, %p1231_p6  ;;  %s1254_s24 = int_to_ptr.vmem [resolvable:$true] %s246_s24 }
  0x36   : > { %s1262_s11 = scalar_lea.sflag [#allocation3], %s234_s7  ;;  %s981_s17 = scalar_lea.hbm %s1252_s10, 512 }
  0x37   : > { %p982_p0 = scmp.ne.s32.totalorder %s1252_s10, %s981_s17  ;;  %p983_p3 = pneg %p1258_p13 }
  0x38   : > { %s986_s12 = scalar_lea.hbm %s1418_s1, 1024  ;;  %p987_p9 = scmp.lt.u32.totalorder %s1252_s10, %s1418_s1 }
  0x39   : > { %p984_p5 = pnand %p983_p3, %p982_p0  ;;  %p988_p1 = scmp.lt.u32.totalorder %s986_s12, %s981_s17 }
  0x3a   : > { %p990_p4 = scmp.lt.u32.totalorder %s981_s17, %s1252_s10 }
  0x3b   : > { %p985_p7 = pneg %p984_p5  ;;  %p989_p2 = por %p988_p1, %p987_p9 }
  0x3d   : > { %p991_p6 = por %p990_p4, %p989_p2 }
  0x3f   : > { %p992_p8 = pnand %p991_p6, %p985_p7 }
  0x41   : > { %995 = shalt.err (!%p992_p8)
}
  0x42   : > { %s996_s7 = scalar_lea.vmem %s1254_s24, 512  ;;  %s1102_s14 = smov [#allocation2]  }
  0x43   : > { %p997_p12 = scmp.ne.s32.totalorder %s1254_s24, %s996_s7  ;;  %s1001_s16 = sshll.u32 %s1102_s14, 4  ;;  %s1002_s16 = int_to_ptr.vmem [resolvable:$false] %s1001_s16 }
  0x44   : > { %s1003_s6 = scalar_lea.vmem %s1002_s16, 1024  ;;  %p1004_p5 = scmp.lt.s32.totalorder %s1254_s24, %s1002_s16 }
  0x45   : > { %p999_p11 = pnand %p997_p12, %p983_p3  ;;  %p1005_p9 = scmp.lt.s32.totalorder %s1003_s6, %s996_s7 }
  0x47   : > { %p1000_p0 = pneg %p999_p11  ;;  %p1006_p1 = por %p1005_p9, %p1004_p5 }
  0x49   : > { %p1007_p2 = pnand %p1006_p1, %p1000_p0 }
  0x4b   : > { %1010 = shalt.err (!%p1007_p2)
}
  0x4c   : > { %s1438_s17 = smov 128   ;;  %p1439_p3 = scmp.ne.s32.totalorder %s1432_s30, 0 }
  0x4d   : > { %887 = dma.hbm_to_vmem [thread:$0]  (!%p1258_p13), %s1252_s10, 512, %s1254_s24, %s1262_s11, %s1438_s17, %s1438_s17, %s1101_s25  }
  0x4e   : > { %258 = sbr.rel (%p1439_p3) target bundleno = 340 (0x154), region = 36  ;;  %s1296_s12 = sand.u32 (!%p1439_p3), 1, %s1081_s19  }
  0x4f   : > { %s784_s27 = sshll.u32 (!%p1439_p3), %s1296_s12, 5  ;;  %s261_s7 = scalar_lea.sflag (!%p1439_p3), [#allocation3], %s1296_s12 }
  0x50   : > { %s264_s13 = scalar_lea.vmem (!%p1439_p3), [#allocation2], %s784_s27  ;;  %p1440_p7 = scmp.ne.s32.totalorder (!%p1439_p3), %s1430_s28, 0 }
  0x55   : > { %1064 = dma.done.wait (%p1440_p7), %s261_s7, 512  }
  0x56   : > { %1066 = vsyncadd (%p1440_p7), %s261_s7, 4294966784  ;;  %p1441_p13 = scmp.ne.s32.totalorder %s1428_s26, 0 }
  0x58   : > { %1068 = dma.done.wait (%p1441_p13), [#allocation6], 1024  }
  0x59   : > { %1070 = vsyncadd (%p1441_p13), [#allocation6], 4294966272  ;;  %p311_p4 = scmp.lt.s32.totalorder %s1089_s21, 1  ;;  %v1103_v0 = vmov 0   ;;  %v1104_v1 = vmov 1.0   ;;  %v331_v4 = vld [vmem:[%s264_s13] sm:$0xff] }
  0x5a   : > { %952 = vset.pattern.permute.xlu1 %v1103_v0  ;;  %951 = vset.pattern.permute.xlu0 %v1103_v0  ;;  %vm363_vm0 = vcmask 261120   ;;  %v332_v6 = vld [vmem:[%s264_s13 + $0x8] sm:$0xff]  ;;  %v333_v11 = vld [vmem:[%s264_s13 + $0x10] sm:$0xff]  ;;  %v334_v12 = vld [vmem:[%s264_s13 + $0x18] sm:$0xff]  ;;  %s300_s13 = scalar_lea.vmem [#allocation7], %s784_s27  ;;  %s601_s11 = scalar_lea.sflag [#allocation4], %s1296_s12 }
  0x5b   : > { %s312_s30 = scalar_select %p311_p4, %s1089_s21, 1  ;;  %v864_v9 = vpack.c.bf16 %v332_v6, %v331_v4  ;;  %v335_v13 = vld [vmem:[#allocation5] sm:$0xff]  ;;  %v868_v14 = vpack.c.bf16 %v334_v12, %v333_v11  ;;  %v341_v16 = vld [vmem:[%s1420_s3 + $0x10] sm:$0xff]  ;;  %v336_v18 = vld [vmem:[#allocation5 + $0x8] sm:$0xff] }
  0x5c   : > { %836 = vmatprep.mubr.msk.f32.mxu0 %vm363_vm0, %v335_v13  ;;  %v462_v15 = vld [vmem:[#allocation5 + $0x20] sm:$0xff]  ;;  %355 = vperm.xlu1 %952, %v341_v16   ;;  %v342_v19 = vld [vmem:[%s1420_s3 + $0x18] sm:$0xff]  ;;  %v463_v20 = vld [vmem:[#allocation5 + $0x28] sm:$0xff]  ;;  %s1105_s14 = smov [#allocation7]  }
  0x5d   : > { %s809_s24 = sshll.u32 %s312_s30, 5  ;;  %s810_s25 = sshll.u32 %s312_s30, 6  ;;  %865 = vmatprep.subr.bf16.mxu1 %v864_v9  ;;  %v339_v17 = vld [vmem:[%s1420_s3] sm:$0xff]  ;;  %850 = vmatprep.mubr.msk.f32.mxu1 %vm363_vm0, %v462_v15  ;;  %v337_v21 = vld [vmem:[#allocation5 + $0x10] sm:$0xff]  ;;  %v340_v23 = vld [vmem:[%s1420_s3 + $0x8] sm:$0xff] }
  0x5e   : > { %s318_s28 = scalar_lea.vmem %s1417_s0, %s809_s24  ;;  %s1318_s6 = scalar_lea.vmem %s1422_s5, %s810_s25  ;;  %867 = vmatpush3.bf16.msra.mxu1 %v864_v9  ;;  %345 = vperm.xlu0 %951, %v339_v17   ;;  %v464_v22 = vld [vmem:[#allocation5 + $0x30] sm:$0xff]  ;;  %v338_v24 = vld [vmem:[#allocation5 + $0x18] sm:$0xff]  ;;  %v796_v25 = vld [vmem:[%s1420_s3 + $0x28] sm:$0xff] }
  0x5f   : > { %593 = vst [vmem:[%s1318_s6 + $0x8] sm:$0x1] %v1104_v1  ;;  %595 = vst [vmem:[%s1318_s6 + $0x18] sm:$0x1] %v1104_v1  ;;  %v327_v2 = vld [vmem:[%s318_s28] sm:$0xff]  ;;  %v328_v3 = vld [vmem:[%s318_s28 + $0x8] sm:$0xff]  ;;  %869 = vmatprep.subr.bf16.mxu1 %v868_v14 }
  0x60   : > { %597 = vst [vmem:[%s1318_s6 + $0x28] sm:$0x1] %v1104_v1  ;;  %599 = vst [vmem:[%s1318_s6 + $0x38] sm:$0x1] %v1104_v1  ;;  %v856_v5 = vpack.c.bf16 %v328_v3, %v327_v2  ;;  %v329_v7 = vld [vmem:[%s318_s28 + $0x10] sm:$0xff]  ;;  %v330_v8 = vld [vmem:[%s318_s28 + $0x18] sm:$0xff]  ;;  %360 = vperm.xlu1 %952, %v342_v19  }
  0x61   : > { %v860_v10 = vpack.c.bf16 %v330_v8, %v329_v7  ;;  %v465_v26 = vld [vmem:[#allocation5 + $0x38] sm:$0xff]  ;;  %v795_v27 = vld [vmem:[%s1420_s3 + $0x20] sm:$0xff]  ;;  %v797_v29 = vld [vmem:[%s1420_s3 + $0x30] sm:$0xff]  ;;  %s623_s24 = sshll.u32 %s300_s13, 4  ;;  %s811_s25 = sshll.u32 %s1089_s21, 9  ;;  %s1359_s24 = int_to_ptr.vmem [resolvable:$true] %s623_s24 }
  0x62   : > { %857 = vmatprep.subr.bf16.mxu0 %v856_v5  ;;  %871 = vmatpush3.bf16.msra.mxu1 %v868_v14  ;;  %v798_v28 = vld [vmem:[%s1420_s3 + $0x38] sm:$0xff]  ;;  %s1366_s10 = scalar_lea.hbm %s1421_s4, %s811_s25  ;;  %s1011_s28 = scalar_lea.vmem %s1359_s24, 512 }
  0x63   : > { %859 = vmatpush3.bf16.msra.mxu0 %v856_v5  ;;  %350 = vperm.xlu0 %951, %v340_v23   ;;  %p1012_p6 = scmp.ne.s32.totalorder %s1359_s24, %s1011_s28  ;;  %s1015_s16 = sshll.u32 %s1105_s14, 4  ;;  %s1016_s16 = int_to_ptr.vmem [resolvable:$false] %s1015_s16 }
  0x64   : > { %861 = vmatprep.subr.bf16.mxu0 %v860_v10  ;;  %478 = vperm.xlu1 %952, %v796_v25   ;;  %s1017_s26 = scalar_lea.vmem %s1016_s16, 1024  ;;  %p1018_p11 = scmp.lt.s32.totalorder %s1359_s24, %s1016_s16 }
  0x65   : > { %851 = vmatmul.mubr.msk.f32.vlgmr.msra.gmra.mrb[0].mxu1 %vm363_vm0, %v463_v20  ;;  %p1013_p8 = pnand %p1012_p6, %p1237_p10  ;;  %p1019_p0 = scmp.lt.s32.totalorder %s1017_s26, %s1011_s28 }
  0x66   : > { %853 = vmatprep.mubr.msk.f32.mxu1 %vm363_vm0, %v464_v22 }
  0x67   : > { %863 = vmatpush3.bf16.msra.mxu0 %v860_v10  ;;  %473 = vperm.xlu0 %951, %v795_v27   ;;  %p1014_p12 = pneg %p1013_p8  ;;  %p1020_p5 = por %p1019_p0, %p1018_p11 }
  0x68   : > { %488 = vperm.xlu1 %952, %v798_v28  }
  0x69   : > { %854 = vmatmul.mubr.msk.f32.gmra.mrb[2].mxu1 %vm363_vm0, %v465_v26  ;;  %p1021_p9 = pnand %p1020_p5, %p1014_p12 }
  0x6a   : > { %837 = vmatmul.mubr.msk.f32.vlgmr.msra.gmra.mrb[0].mxu0 %vm363_vm0, %v336_v18 }
  0x6b   : > { %839 = vmatprep.mubr.msk.f32.mxu0 %vm363_vm0, %v337_v21  ;;  %483 = vperm.xlu0 %951, %v797_v29  }
  0x6e   : > { %840 = vmatmul.mubr.msk.f32.gmra.mrb[2].mxu0 %vm363_vm0, %v338_v24 }
  0xdb   : > { %v356_v30 = vpop.permute.xlu1 %355 }
  0xdd   : > { %v346_v31 = vpop.permute.xlu0 %345 }
  0xdf   : > { %v361_v32 = vpop.permute.xlu1 %360 }
  0xe2   : > { %v351_v33 = vpop.permute.xlu0 %350 }
  0xe3   : > { %v479_v34 = vpop.permute.xlu1 %478 }
  0xe6   : > { %v474_v35 = vpop.permute.xlu0 %473 }
  0xe7   : > { %v489_v44 = vpop.permute.xlu1 %488 }
  0xea   : > { %v484_v49 = vpop.permute.xlu0 %483 }
 0x138   : > { %v852_v38 = vpop.f32.mrb[0].mxu1 }
 0x139   : > { %v575_v40 = vadd.f32 %v852_v38, %v479_v34  ;;  %v569_v42 = vpop.f32.mrb[1].mxu1 }
 0x13a   : > { %v570_v43 = vadd.f32 %v569_v42, %v474_v35 }
 0x13b   : > { %594 = vst [vmem:[%s1318_s6 + $0x10] sm:$0xff] %v575_v40 }
 0x13c   : > { %592 = vst [vmem:[%s1318_s6] sm:$0xff] %v570_v43  ;;  %v855_v47 = vpop.f32.mrb[2].mxu1 }
 0x13d   : > { %v838_v36 = vpop.f32.mrb[0].mxu0  ;;  %v585_v50 = vadd.f32 %v855_v47, %v489_v44  ;;  %v579_v52 = vpop.f32.mrb[3].mxu1 }
 0x13e   : > { %v448_v37 = vadd.f32 %v838_v36, %v351_v33  ;;  %v442_v39 = vpop.f32.mrb[1].mxu0  ;;  %v580_v53 = vadd.f32 %v579_v52, %v484_v49 }
 0x13f   : > { %v443_v41 = vadd.f32 %v442_v39, %v346_v31  ;;  %598 = vst [vmem:[%s1318_s6 + $0x30] sm:$0xff] %v585_v50 }
 0x140   : > { %589 = vst [vmem:[%s300_s13 + $0x8] sm:$0xff] %v448_v37  ;;  %596 = vst [vmem:[%s1318_s6 + $0x20] sm:$0xff] %v580_v53 }
 0x141   : > { %588 = vst [vmem:[%s300_s13] sm:$0xff] %v443_v41  ;;  %v841_v45 = vpop.f32.mrb[2].mxu0 }
 0x142   : > { %v458_v46 = vadd.f32 %v841_v45, %v361_v32  ;;  %v452_v48 = vpop.f32.mrb[3].mxu0 }
 0x143   : > { %v453_v51 = vadd.f32 %v452_v48, %v356_v30 }
 0x144   : > { %591 = vst [vmem:[%s300_s13 + $0x18] sm:$0xff] %v458_v46 }
 0x145   : > { %590 = vst [vmem:[%s300_s13 + $0x10] sm:$0xff] %v453_v51 }
 0x146   : > { %1024 = shalt.err (!%p1021_p9)
}
 0x147   : > { %s1025_s6 = scalar_lea.hbm %s1366_s10, 512  ;;  %s1029_s30 = scalar_lea.hbm %s1421_s4, 1024 }
 0x148   : > { %p1026_p1 = scmp.ne.s32.totalorder %s1366_s10, %s1025_s6  ;;  %p1030_p7 = scmp.lt.u32.totalorder %s1366_s10, %s1421_s4 }
 0x149   : > { %p1031_p13 = scmp.lt.u32.totalorder %s1029_s30, %s1025_s6  ;;  %p1033_p6 = scmp.lt.u32.totalorder %s1025_s6, %s1366_s10 }
 0x14a   : > { %p1027_p2 = pnand %p1026_p1, %p1237_p10 }
 0x14b   : > { %p1032_p4 = por %p1031_p13, %p1030_p7 }
 0x14c   : > { %p1028_p3 = pneg %p1027_p2 }
 0x14d   : > { %p1034_p8 = por %p1033_p6, %p1032_p4 }
 0x14f   : > { %p1035_p12 = pnand %p1034_p8, %p1028_p3 }
 0x151   : > { %1038 = shalt.err (!%p1035_p12)
}
 0x152   : > { %s1106_s27 = smov 128   ;;  %s1107_s21 = smov 8  }
 0x153   : > { %878 = dma.vmem_to_hbm [thread:$0]  (%p1237_p10), %s1359_s24, 512, %s1366_s10, %s601_s11, %s1106_s27, %s1106_s27, %s1107_s21  }
 0x154 PF: > { %s641_s28 = sand.u32 1, %s1077_s18   ;;  %p1442_p11 = scmp.ne.s32.totalorder %s1431_s29, 0 }
 0x155   : > { %p1443_p0 = scmp.ge.s32.totalorder %s1097_s23, 2  ;;  %s642_s14 = scalar_lea.sflag [#allocation4], %s641_s28 }
 0x157   : > { %p889_p5 = pnand %p1443_p0, %p1442_p11 }
 0x159   : > { %1072 = dma.done.wait (!%p889_p5), %s642_s14, 512  }
 0x15a   : > { %1074 = vsyncadd (!%p889_p5), %s642_s14, 4294966784  ;;  %s23_s23 = sadd.s32 1, %s1097_s23   ;;  %s1444_s18 = smov %s1081_s19 }
 0x15b   : > { %p20_p9 = scmp.ge.s32.totalorder %s23_s23, 4   ;;  %s1445_s19 = smov %s1085_s20 }
 0x15c   : > { %s1446_s20 = smov %s1246_s15  ;;  %s1447_s21 = smov %s1093_s22 }
 0x15d   : > { %s1448_s22 = smov %s1450_s9  ;;  %22 = sbr.rel (!%p20_p9) target bundleno = 7 (0x7), region = 102 }
 0x164   :  { %658 = vsyncpa [#allocation3], 1 }
 0x165   :  { %660 = vsyncpa [#allocation3 + $0x1], 1 }
 0x166   :  { %661 = vsyncpa [#allocation6], 1 }
 0x167   :  { %662 = vsyncpa [#allocation4], 1 }
 0x168   :  { %664 = vsyncpa [#allocation4 + $0x1], 1 }

</bundles_post_ra>
